<compile_context>
chip_gen: v7x
topology: tpu7x:2x2x1
jax: 0.10.0
libtpu: 0.0.40
codegen_flags: <defaults>
</compile_context>

<pallas_src>
import math

import jax
import jax.numpy as jnp
from jax.experimental import pallas as pl
from jax.experimental.pallas import tpu as pltpu


# -----------------------------------------------------------------------------
# PE table construction (identical to the PyTorch __init__).
# -----------------------------------------------------------------------------
def make_pe_table(d_model: int, max_len: int = 1000) -> jnp.ndarray:
    position = jnp.arange(0, max_len, dtype=jnp.float32)[:, None]            # (max_len, 1)
    div_term = jnp.exp(
        jnp.arange(0, d_model, 2, dtype=jnp.float32) * (-math.log(10000.0) / d_model)
    )                                                                         # (ceil(D/2),)
    pe = jnp.zeros((max_len, d_model), dtype=jnp.float32)
    pe = pe.at[:, 0::2].set(jnp.sin(position * div_term))
    if d_model % 2 == 1:
        pe = pe.at[:, 1::2].set(jnp.cos(position * div_term[:-1]))
    else:
        pe = pe.at[:, 1::2].set(jnp.cos(position * div_term))
    return pe


# -----------------------------------------------------------------------------
# Kernel bodies.
# -----------------------------------------------------------------------------
def _pe_add_kernel_2d(x_ref, pe_ref, o_ref):
    # x/o: (TN, C) tile of one batch element (batch dim squeezed).  pe: (TN, C).
    # Single VPU add per vreg; no broadcast, no relayout.
    o_ref[...] = x_ref[...].astype(o_ref.dtype) + pe_ref[...]


def _pe_add_kernel_3d(x_ref, pe_ref, o_ref):
    # x/o: (KB, TN, C) tile covering KB batch elements.  pe: (TN, C), broadcast
    # once per kernel invocation (still a single VPU add per vreg).
    o_ref[...] = x_ref[...].astype(o_ref.dtype) + pe_ref[...][None, :, :]


# -----------------------------------------------------------------------------
# Tiling policy.
# -----------------------------------------------------------------------------
_TARGET_TILE_BYTES = 4 << 20   # ~4 MiB per x tile (larger, fewer DMAs)
_PALLAS_MIN_BYTES = 2 << 20    # below this, plain XLA add beats any pallas_call


def _sublane_multiple(dtype) -> int:
    # Sub-32-bit dtypes pack rows along sublanes: bf16 vreg is [16,128], int8 [32,128].
    return {4: 8, 2: 16, 1: 32}.get(jnp.dtype(dtype).itemsize, 8)


def _choose_tiling(B, R, C, x_dtype, out_dtype):
    """Pick (kb, tn): x/out block shape is (kb, tn, C)."""
    narrow = x_dtype if jnp.dtype(x_dtype).itemsize <= jnp.dtype(out_dtype).itemsize else out_dtype
    g = _sublane_multiple(narrow)
    row_bytes = C * jnp.dtype(out_dtype).itemsize
    slab_bytes = R * row_bytes

    if slab_bytes >= _TARGET_TILE_BYTES or B == 1:
        # One batch element per grid step; tile its row axis.
        if R <= g:
            tn = R                                  # full-dim block is always legal
        else:
            tn = min(R, max(g, _TARGET_TILE_BYTES // max(row_bytes, 1)))
            tn = max(g, (tn // g) * g)
            # v7x has 2 TensorCores sharded over the "parallel" axes: avoid a
            # degenerate 1x1 grid when B == 1 by splitting the row axis in two.
            if B == 1 and pl.cdiv(R, tn) == 1 and R >= 2 * g:
                tn = max(g, ((pl.cdiv(R, 2) + g - 1) // g) * g)
        return 1, tn

    # Small per-batch slab and B > 1: pack several batch elements per grid step
    # so each step still moves MiB-scale DMAs.  Keep >= 2 batch blocks so both
    # v7x TensorCores get work (no-op on single-TC v5e/v6e).
    kb_cap = max(1, _TARGET_TILE_BYTES // max(slab_bytes, 1))
    kb_cap = min(kb_cap, max(1, B // 2))
    kb = 1
    for cand in range(1, B + 1):
        if B % cand == 0 and cand <= kb_cap:
            kb = cand
    return kb, R


# -----------------------------------------------------------------------------
# pallas_call wrapper.
# -----------------------------------------------------------------------------
def _pe_add_tiled(x3, pe2, out_dtype, donate_x):
    """x3: (B, R, C), pe2: (R, C) in out_dtype.  Returns x3 + pe2[None, :, :]."""
    B, R, C = x3.shape
    x_item = jnp.dtype(x3.dtype).itemsize
    o_item = jnp.dtype(out_dtype).itemsize

    kb, tn = _choose_tiling(B, R, C, x3.dtype, out_dtype)
    n_row_blocks = pl.cdiv(R, tn)
    n_batch_blocks = pl.cdiv(B, kb)
    pe_single_buffer = n_batch_blocks > 1   # pe re-DMA amortized over inner axis

    # VMEM budget: x/out double-buffered, pe single-buffered when reused across
    # the inner batch axis.  Explicit limit so 4 MiB tiles also pass v5e's
    # 16 MiB scoped default; stays well under v7x's 64 MiB physical VMEM.
    x_tile = kb * tn * C * x_item
    o_tile = kb * tn * C * o_item
    pe_tile = tn * C * o_item
    vmem_need = 2 * x_tile + 2 * o_tile + (1 if pe_single_buffer else 2) * pe_tile
    vmem_limit = int(min(max(vmem_need + (4 << 20), 32 << 20), 64 << 20))

    cost = pl.CostEstimate(
        flops=B * R * C,
        transcendentals=0,
        bytes_accessed=B * R * C * (x_item + o_item) + R * C * o_item,
    )

    # Alias x -> out only when dtypes match; truly in-place only if the caller
    # also donates x at the jit boundary (otherwise XLA inserts a copy).
    aliases = {0: 0} if (donate_x and x3.dtype == out_dtype) else {}

    if kb == 1:
        kernel = _pe_add_kernel_2d
        xo_block = (None, tn, C)            # batch dim squeezed -> clean 2-D body
    else:
        kernel = _pe_add_kernel_3d
        xo_block = (kb, tn, C)

    def build(pe_buffered_one):
        pe_kwargs = dict(pipeline_mode=pl.Buffered(1)) if pe_buffered_one else {}
        return pl.pallas_call(
            kernel,
            out_shape=jax.ShapeDtypeStruct((B, R, C), out_dtype),
            grid_spec=pltpu.PrefetchScalarGridSpec(
                num_scalar_prefetch=0,
                # Row-tile axis outer, batch axis inner: the resident pe tile is
                # reused across every inner batch step without re-DMA.
                grid=(n_row_blocks, n_batch_blocks),
                in_specs=[
                    pl.BlockSpec(xo_block, lambda r, b: (b, r, 0)),              # x
                    pl.BlockSpec((tn, C), lambda r, b: (r, 0), **pe_kwargs),     # pe
                ],
                out_specs=pl.BlockSpec(xo_block, lambda r, b: (b, r, 0)),
            ),
            compiler_params=pltpu.CompilerParams(
                # Both axes independent -> megacore sharding on v7x; no-op on v5e/v6e.
                dimension_semantics=("parallel", "parallel"),
                vmem_limit_bytes=vmem_limit,
            ),
            cost_estimate=cost,
            input_output_aliases=aliases,
        )

    if pe_single_buffer:
        try:
            return build(True)(x3, pe2)
        except Exception:
            # Fall back to default double-buffering if Buffered(1) is rejected.
            pass
    return build(False)(x3, pe2)


def positional_encoding_forward(x, pe, *, donate_x=False, use_pallas=None):
    """x: (B, L, D); pe: (max_len, D).  Returns x + pe[:L][None] (torch promotion)."""
    B, L, D = x.shape
    # Match torch type promotion (e.g. bf16 x + f32 pe table -> f32 result).
    out_dtype = jnp.result_type(x.dtype, pe.dtype)
    pe_slice = pe[:L, :].astype(out_dtype)

    if use_pallas is None:
        # Tiny activations: fixed pallas_call launch / pipeline setup dominates,
        # so the plain XLA elementwise add is strictly faster there.
        use_pallas = x.size * jnp.dtype(x.dtype).itemsize >= _PALLAS_MIN_BYTES
    if not use_pallas:
        return x.astype(out_dtype) + pe_slice[None, :, :]

    M = L * D
    if M % 128 == 0:
        # Lane-dense path: view each (L, D) slab as (M//128, 128) rows so every
        # output store is a full-lane vst (no vst.msk), then tile the row axis.
        R = M // 128
        out = _pe_add_tiled(
            x.reshape(B, R, 128), pe_slice.reshape(R, 128), out_dtype, donate_x
        )
        return out.reshape(B, L, D)

    # Non-128-aligned fallback: pad the flattened per-batch slab up to a multiple
    # of 128 so stores stay lane-dense, then strip the padding afterwards.
    Mp = ((M + 127) // 128) * 128
    Rp = Mp // 128
    x_pad = jnp.pad(x.reshape(B, M), ((0, 0), (0, Mp - M)))
    pe_pad = jnp.pad(pe_slice.reshape(M), (0, Mp - M))
    out = _pe_add_tiled(
        x_pad.reshape(B, Rp, 128), pe_pad.reshape(Rp, 128), out_dtype, False
    )
    return out.reshape(B, Mp)[:, :M].reshape(B, L, D)


if __name__ == "__main__":
    MAX_LEN = 1000

    def run_and_check(B, L, D, force_pallas):
        key = jax.random.PRNGKey(0)
        x = jax.random.normal(key, (B, L, D), dtype=jnp.float32)
        pe = make_pe_table(D, MAX_LEN)
        out = jax.block_until_ready(
            positional_encoding_forward(x, pe, use_pallas=force_pallas)
        )
        ref = x + pe[:L, :][None, :, :]
        assert out.shape == (B, L, D)
        assert out.dtype == ref.dtype
        assert jnp.allclose(out, ref, atol=1e-6), f"mismatch at {(B, L, D)}"

    # Small shape consistent with the module (auto-dispatch -> XLA bypass path).
    run_and_check(2, 8, 32, None)
    # Same small shape forced through the Pallas kernel (lane-dense (R,128) view).
    run_and_check(2, 8, 32, True)
    # Batch-blocked path: several batch elements per grid step, pe broadcast in-kernel.
    run_and_check(8, 16, 128, True)
    # Non-128-aligned L*D: padded lane-dense fallback.
    run_and_check(2, 7, 24, True)

    print("KERNEL_OK")
</pallas_src>

<mosaic_0001>
module attributes {stable_mosaic.version = 11 : i64} {
  func.func @_pe_add_kernel_2d(%arg0: i32, %arg1: i32, %arg2: memref<1x2x128xf32, #tpu.memory_space<vmem>>, %arg3: memref<2x128xf32, #tpu.memory_space<vmem>>, %arg4: memref<1x2x128xf32, #tpu.memory_space<vmem>>) attributes {dimension_semantics = [#tpu.dimension_semantics<parallel>, #tpu.dimension_semantics<parallel>], iteration_bounds = array<i64: 1, 2>, scalar_prefetch = 0 : i64, scratch_operands = 0 : i64, tpu.core_type = #tpu.core_type<tc>, window_params = [{transform_indices = @transform_0, window_bounds = array<i64: 1, 2, 128>}, {pipeline_mode = #tpu.pipeline_mode<synchronous>, transform_indices = @transform_1, window_bounds = array<i64: 2, 128>}, {transform_indices = @transform_2, window_bounds = array<i64: 1, 2, 128>}]} {
    %c0 = arith.constant 0 : index
    %c0_0 = arith.constant 0 : index
    %c0_1 = arith.constant 0 : index
    %0 = vector.load %arg2[%c0, %c0_0, %c0_1] : memref<1x2x128xf32, #tpu.memory_space<vmem>>, vector<1x2x128xf32>
    %1 = vector.shape_cast %0 : vector<1x2x128xf32> to vector<2x128xf32>
    %c0_2 = arith.constant 0 : index
    %c0_3 = arith.constant 0 : index
    %2 = vector.load %arg3[%c0_2, %c0_3] : memref<2x128xf32, #tpu.memory_space<vmem>>, vector<2x128xf32>
    %3 = arith.addf %1, %2 : vector<2x128xf32>
    %c0_4 = arith.constant 0 : index
    %c0_5 = arith.constant 0 : index
    %c0_6 = arith.constant 0 : index
    %4 = vector.load %arg4[%c0_4, %c0_5, %c0_6] : memref<1x2x128xf32, #tpu.memory_space<vmem>>, vector<1x2x128xf32>
    %5 = vector.shape_cast %4 : vector<1x2x128xf32> to vector<2x128xf32>
    %6 = vector.shape_cast %3 : vector<2x128xf32> to vector<1x2x128xf32>
    tpu.vector_store %arg4[%c0_4, %c0_5, %c0_6], %6 {strides = array<i32>} : memref<1x2x128xf32, #tpu.memory_space<vmem>>, vector<1x2x128xf32>,
    return
  }
  func.func @transform_0(%arg0: i32, %arg1: i32) -> (i32, i32, i32) {
    %c0_i32 = arith.constant 0 : i32
    %c0_i32_0 = arith.constant 0 : i32
    return %arg1, %arg0, %c0_i32 : i32, i32, i32
  }
  func.func @transform_1(%arg0: i32, %arg1: i32) -> (i32, i32) {
    %c0_i32 = arith.constant 0 : i32
    %c0_i32_0 = arith.constant 0 : i32
    return %arg0, %c0_i32 : i32, i32
  }
  func.func @transform_2(%arg0: i32, %arg1: i32) -> (i32, i32, i32) {
    %c0_i32 = arith.constant 0 : i32
    %c0_i32_0 = arith.constant 0 : i32
    return %arg1, %arg0, %c0_i32 : i32, i32, i32
  }
}

module attributes {stable_mosaic.version = 11 : i64} {
  func.func @_pe_add_kernel_2d(%arg0: i32, %arg1: i32, %arg2: memref<1x2x128xf32, #tpu.memory_space<vmem>>, %arg3: memref<2x128xf32, #tpu.memory_space<vmem>>, %arg4: memref<1x2x128xf32, #tpu.memory_space<vmem>>) attributes {dimension_semantics = [#tpu.dimension_semantics<parallel>, #tpu.dimension_semantics<parallel>], iteration_bounds = array<i64: 1, 2>, scalar_prefetch = 0 : i64, scratch_operands = 0 : i64, tpu.core_type = #tpu.core_type<tc>, window_params = [{transform_indices = @transform_0, window_bounds = array<i64: 1, 2, 128>}, {transform_indices = @transform_1, window_bounds = array<i64: 2, 128>}, {transform_indices = @transform_2, window_bounds = array<i64: 1, 2, 128>}]} {
    %c0 = arith.constant 0 : index
    %c0_0 = arith.constant 0 : index
    %c0_1 = arith.constant 0 : index
    %0 = vector.load %arg2[%c0, %c0_0, %c0_1] : memref<1x2x128xf32, #tpu.memory_space<vmem>>, vector<1x2x128xf32>
    %1 = vector.shape_cast %0 : vector<1x2x128xf32> to vector<2x128xf32>
    %c0_2 = arith.constant 0 : index
    %c0_3 = arith.constant 0 : index
    %2 = vector.load %arg3[%c0_2, %c0_3] : memref<2x128xf32, #tpu.memory_space<vmem>>, vector<2x128xf32>
    %3 = arith.addf %1, %2 : vector<2x128xf32>
    %c0_4 = arith.constant 0 : index
    %c0_5 = arith.constant 0 : index
    %c0_6 = arith.constant 0 : index
    %4 = vector.load %arg4[%c0_4, %c0_5, %c0_6] : memref<1x2x128xf32, #tpu.memory_space<vmem>>, vector<1x2x128xf32>
    %5 = vector.shape_cast %4 : vector<1x2x128xf32> to vector<2x128xf32>
    %6 = vector.shape_cast %3 : vector<2x128xf32> to vector<1x2x128xf32>
    tpu.vector_store %arg4[%c0_4, %c0_5, %c0_6], %6 {strides = array<i32>} : memref<1x2x128xf32, #tpu.memory_space<vmem>>, vector<1x2x128xf32>,
    return
  }
  func.func @transform_0(%arg0: i32, %arg1: i32) -> (i32, i32, i32) {
    %c0_i32 = arith.constant 0 : i32
    %c0_i32_0 = arith.constant 0 : i32
    return %arg1, %arg0, %c0_i32 : i32, i32, i32
  }
  func.func @transform_1(%arg0: i32, %arg1: i32) -> (i32, i32) {
    %c0_i32 = arith.constant 0 : i32
    %c0_i32_0 = arith.constant 0 : i32
    return %arg0, %c0_i32 : i32, i32
  }
  func.func @transform_2(%arg0: i32, %arg1: i32) -> (i32, i32, i32) {
    %c0_i32 = arith.constant 0 : i32
    %c0_i32_0 = arith.constant 0 : i32
    return %arg1, %arg0, %c0_i32 : i32, i32, i32
  }
}

</mosaic_0001>

<bundles_post_ra>
// kernel: tpu_custom_call.1
= control target key start
LH: loop header
LB: loop body
LE: loop exit
PB: predicated region body
PF: predicated region fallthrough
CT: control target
= control target key end

     0   :  { %7 = vsyncpa [#allocation3], 0  ;;  %s689_s0 = inlined_call_operand.hbm [shape: f32[2,2,128], index: 0, kind: input, shape index: {}]   ;;  %s690_s1 = inlined_call_operand.vmem [shape: f32[2,128], index: 1, kind: input, shape index: {}]   ;;  %s691_s2 = inlined_call_operand.hbm [shape: f32[2,2,128], index: 2, kind: output, shape index: {}]  }
   0x1   :  { %9 = vsyncpa [#allocation3 + $0x1], 0 }
   0x2   :  { %10 = vsyncpa [#allocation4], 0 }
   0x3   :  { %12 = vsyncpa [#allocation4 + $0x1], 0  ;;  %s514_s9 = smov 0   ;;  %s516_s10 = smov 0  }
   0x4   :  { %s518_s11 = smov 0   ;;  %s520_s12 = smov 0  }
   0x5   :  { %s522_s13 = smov 0   ;;  %s524_s14 = smov 0  }
   0x6 LB: > { %s307_s15 = sadd.s32 4294967295, %s495_s14   ;;  %s308_s16 = sadd.s32 4294967294, %s495_s14   ;;  %s495_s14 = sphi %s524_s14, %s18_s14   ;;  %s491_s13 = sphi %s522_s13, %s707_s13   ;;  %s487_s12 = sphi %s520_s12, %s706_s12   ;;  %s483_s11 = sphi %s518_s11, %s705_s11   ;;  %s479_s10 = sphi %s516_s10, %s704_s10   ;;  %s475_s9 = sphi %s514_s9, %s703_s9  }
   0x7   : > { %s27_s17 = sadd.s32 1, %s491_s13  ;;  %s39_s18 = sadd.s32 1, %s483_s11 }
   0x8   : > { %p28_p0 = scmp.ge.s32.totalorder %s27_s17, 2  ;;  %p46_p1 = scmp.ne.s32.totalorder %s483_s11, %s479_s10 }
   0x9   : > { %p47_p2 = scmp.eq.s32.totalorder %s495_s14, 0  ;;  %p52_p3 = scmp.ne.s32.totalorder %s479_s10, %s475_s9 }
   0xa   : > { %s709_s17 = smov (%p28_p0, %s27_s17), 0  ;;  %p53_p5 = scmp.eq.s32.totalorder %s307_s15, 0 }
   0xb   : > { %p555_p4 = por %p47_p2, %p46_p1  ;;  %s34_s20 = ssub.s32 %s491_s13, %s709_s17 }
   0xc   : > { %p104_p6 = scmp.eq.s32.totalorder %s307_s15, 1  ;;  %p37_p7 = scmp.eq.s32.totalorder %s34_s20, 0 }
   0xd   : > { %p561_p8 = por %p53_p5, %p52_p3  ;;  %p110_p10 = scmp.eq.s32.totalorder %s308_s16, 1 }
   0xe   : > { %p565_p9 = por %p104_p6, %p46_p1  ;;  %p333_p13 = scmp.lt.s32.totalorder %s495_s14, 2 }
   0xf   : > { %s570_s23 = scalar_select %p37_p7, %s483_s11, %s39_s18  }
  0x10   : > { %s695_s22 = scalar_select %p565_p9, 1, 0 }
  0x11   : > { %p572_p11 = por %p110_p10, %p52_p3  ;;  %s137_s25 = sand.u32 1, %s483_s11  }
  0x12   : > { %s312_s26 = sshll.u32 %s137_s25, 1  ;;  %s313_s27 = sshll.u32 %s491_s13, 5 }
  0x13   : > { %s696_s24 = scalar_select %p572_p11, 1, 0 }
  0x14   : > { %s583_s30 = scalar_lea.hbm %s689_s0, %s313_s27  ;;  %s141_s3 = scalar_lea.vmem [#allocation2], %s312_s26 }
  0x15   : > { %s149_s4 = sshll.u32 %s141_s3, 4  ;;  %p589_p0 = pnand %p333_p13, %p555_p4  ;;  %s585_s4 = int_to_ptr.vmem [resolvable:$true] %s149_s4 }
  0x16   : > { %s138_s6 = scalar_lea.sflag [#allocation3], %s137_s25  ;;  %s383_s7 = scalar_lea.hbm %s583_s30, 32 }
  0x17   : > { %p384_p3 = scmp.ne.s32.totalorder %s583_s30, %s383_s7  ;;  %p385_p5 = pneg %p589_p0 }
  0x18   : > { %s388_s16 = scalar_lea.hbm %s689_s0, 64  ;;  %p389_p4 = scmp.lt.u32.totalorder %s583_s30, %s689_s0 }
  0x19   : > { %p386_p6 = pnand %p385_p5, %p384_p3  ;;  %p390_p10 = scmp.lt.u32.totalorder %s388_s16, %s383_s7 }
  0x1a   : > { %p392_p12 = scmp.lt.u32.totalorder %s383_s7, %s583_s30 }
  0x1b   : > { %p387_p7 = pneg %p386_p6  ;;  %p391_p13 = por %p390_p10, %p389_p4 }
  0x1d   : > { %p393_p1 = por %p392_p12, %p391_p13 }
  0x1f   : > { %p394_p2 = pnand %p393_p1, %p387_p7 }
  0x21   : > { %397 = shalt.err (!%p394_p2)
}
  0x22   : > { %s398_s20 = scalar_lea.vmem %s585_s4, 32  ;;  %s497_s25 = smov [#allocation2]  }
  0x23   : > { %p399_p3 = scmp.ne.s32.totalorder %s585_s4, %s398_s20  ;;  %s403_s26 = sshll.u32 %s497_s25, 4  ;;  %s404_s26 = int_to_ptr.vmem [resolvable:$false] %s403_s26 }
  0x24   : > { %s405_s27 = scalar_lea.vmem %s404_s26, 64  ;;  %p406_p9 = scmp.lt.s32.totalorder %s585_s4, %s404_s26 }
  0x25   : > { %p401_p6 = pnand %p399_p3, %p385_p5  ;;  %p407_p4 = scmp.lt.s32.totalorder %s405_s27, %s398_s20 }
  0x27   : > { %p402_p11 = pneg %p401_p6  ;;  %p408_p10 = por %p407_p4, %p406_p9 }
  0x29   : > { %p409_p12 = pnand %p408_p10, %p402_p11 }
  0x2b   : > { %412 = shalt.err (!%p409_p12)
}
  0x2c   : > { %328 = dma.hbm_to_vmem [thread:$0]  (!%p589_p0), %s583_s30, 32, %s585_s4, %s138_s6  }
  0x2d   : > { %p698_p1 = scmp.lt.s32.totalorder %s495_s14, 3  ;;  %p699_p2 = scmp.ge.s32.totalorder %s495_s14, 1 }
  0x2f   : > { %p155_p5 = pnand %p699_p2, %p698_p1 }
  0x30   : > { %s625_s28 = sand.u32 (!%p155_p5), 1, %s479_s10  }
  0x31   : > { %158 = sbr.rel (%p155_p5) target bundleno = 83 (0x53), region = 28  ;;  %s315_s29 = sshll.u32 (!%p155_p5), %s625_s28, 1 }
  0x32   : > { %s161_s3 = scalar_lea.sflag (!%p155_p5), [#allocation3], %s625_s28  ;;  %s164_s7 = scalar_lea.vmem (!%p155_p5), [#allocation2], %s315_s29 }
  0x38   : > { %466 = dma.done.wait (%p561_p8), %s161_s3, 32  }
  0x39   : > { %468 = vsyncadd (%p561_p8), %s161_s3, 4294967264  ;;  %s188_s30 = scalar_lea.vmem [#allocation5], %s315_s29  ;;  %s318_s5 = sshll.u32 %s487_s12, 5  ;;  %v193_v0 = vld [vmem:[%s164_s7] sm:$0x3] }
  0x3a   : > { %s212_s4 = sshll.u32 %s188_s30, 4  ;;  %v194_v1 = vld [vmem:[%s690_s1] sm:$0x3]  ;;  %s642_s21 = scalar_lea.hbm %s691_s2, %s318_s5  ;;  %s637_s4 = int_to_ptr.vmem [resolvable:$true] %s212_s4 }
  0x3b   : > { %v195_v2 = vadd.f32 %v194_v1, %v193_v0  ;;  %s198_s18 = scalar_lea.sflag [#allocation4], %s625_s28  ;;  %s413_s19 = scalar_lea.vmem %s637_s4, 32 }
  0x3c   : > { %p414_p8 = scmp.ne.s32.totalorder %s637_s4, %s413_s19  ;;  %p700_p9 = scmp.ne.s32.totalorder %s695_s22, 0 }
  0x3d   : > { %196 = vst [vmem:[%s188_s30] sm:$0x3] %v195_v2  ;;  %s498_s12 = smov [#allocation5]  }
  0x3e   : > { %p415_p11 = pnand %p414_p8, %p700_p9  ;;  %s417_s20 = sshll.u32 %s498_s12, 4  ;;  %s418_s20 = int_to_ptr.vmem [resolvable:$false] %s417_s20 }
  0x3f   : > { %s419_s25 = scalar_lea.vmem %s418_s20, 64  ;;  %p420_p7 = scmp.lt.s32.totalorder %s637_s4, %s418_s20 }
  0x40   : > { %p416_p0 = pneg %p415_p11  ;;  %p421_p13 = scmp.lt.s32.totalorder %s419_s25, %s413_s19 }
  0x42   : > { %p422_p3 = por %p421_p13, %p420_p7 }
  0x44   : > { %p423_p6 = pnand %p422_p3, %p416_p0 }
  0x46   : > { %426 = shalt.err (!%p423_p6)
}
  0x47   : > { %s427_s26 = scalar_lea.hbm %s642_s21, 32  ;;  %s431_s29 = scalar_lea.hbm %s691_s2, 64 }
  0x48   : > { %p428_p4 = scmp.ne.s32.totalorder %s642_s21, %s427_s26  ;;  %p432_p1 = scmp.lt.u32.totalorder %s642_s21, %s691_s2 }
  0x49   : > { %p433_p2 = scmp.lt.u32.totalorder %s431_s29, %s427_s26  ;;  %p435_p8 = scmp.lt.u32.totalorder %s427_s26, %s642_s21 }
  0x4a   : > { %p429_p10 = pnand %p428_p4, %p700_p9 }
  0x4b   : > { %p434_p5 = por %p433_p2, %p432_p1 }
  0x4c   : > { %p430_p12 = pneg %p429_p10 }
  0x4d   : > { %p436_p11 = por %p435_p8, %p434_p5 }
  0x4f   : > { %p437_p0 = pnand %p436_p11, %p430_p12 }
  0x51   : > { %440 = shalt.err (!%p437_p0)
}
  0x52   : > { %323 = dma.vmem_to_hbm [thread:$0]  (%p700_p9), %s637_s4, 32, %s642_s21, %s198_s18  }
  0x53 PF: > { %s224_s30 = sand.u32 1, %s475_s9   ;;  %p701_p7 = scmp.ne.s32.totalorder %s696_s24, 0 }
  0x54   : > { %p702_p13 = scmp.ge.s32.totalorder %s495_s14, 2  ;;  %s225_s5 = scalar_lea.sflag [#allocation4], %s224_s30 }
  0x56   : > { %p330_p3 = pnand %p702_p13, %p701_p7 }
  0x58   : > { %470 = dma.done.wait (!%p330_p3), %s225_s5, 32  }
  0x59   : > { %472 = vsyncadd (!%p330_p3), %s225_s5, 4294967264  ;;  %s18_s14 = sadd.s32 1, %s495_s14   ;;  %s703_s9 = smov %s479_s10 }
  0x5a   : > { %p15_p6 = scmp.ge.s32.totalorder %s18_s14, 4   ;;  %s704_s10 = smov %s483_s11 }
  0x5b   : > { %s705_s11 = smov %s570_s23  ;;  %s706_s12 = smov %s491_s13 }
  0x5c   : > { %s707_s13 = smov %s709_s17  ;;  %17 = sbr.rel (!%p15_p6) target bundleno = 6 (0x6), region = 76 }
  0x63   :  { %230 = vsyncpa [#allocation3], 1 }
  0x64   :  { %232 = vsyncpa [#allocation3 + $0x1], 1 }
  0x65   :  { %233 = vsyncpa [#allocation4], 1 }
  0x66   :  { %235 = vsyncpa [#allocation4 + $0x1], 1 }

// kernel: tpu_custom_call.1
= control target key start
LH: loop header
LB: loop body
LE: loop exit
PB: predicated region body
PF: predicated region fallthrough
CT: control target
= control target key end

     0   :  { %7 = vsyncpa [#allocation3], 0  ;;  %s689_s0 = inlined_call_operand.hbm [shape: f32[2,2,128], index: 0, kind: input, shape index: {}]   ;;  %s690_s1 = inlined_call_operand.vmem [shape: f32[2,128], index: 1, kind: input, shape index: {}]   ;;  %s691_s2 = inlined_call_operand.hbm [shape: f32[2,2,128], index: 2, kind: output, shape index: {}]  }
   0x1   :  { %9 = vsyncpa [#allocation3 + $0x1], 0 }
   0x2   :  { %10 = vsyncpa [#allocation4], 0 }
   0x3   :  { %12 = vsyncpa [#allocation4 + $0x1], 0  ;;  %s514_s9 = smov 0   ;;  %s516_s10 = smov 0  }
   0x4   :  { %s518_s11 = smov 0   ;;  %s520_s12 = smov 0  }
   0x5   :  { %s522_s13 = smov 0   ;;  %s524_s14 = smov 0  }
   0x6 LB: > { %s307_s15 = sadd.s32 4294967295, %s495_s14   ;;  %s308_s16 = sadd.s32 4294967294, %s495_s14   ;;  %s495_s14 = sphi %s524_s14, %s18_s14   ;;  %s491_s13 = sphi %s522_s13, %s707_s13   ;;  %s487_s12 = sphi %s520_s12, %s706_s12   ;;  %s483_s11 = sphi %s518_s11, %s705_s11   ;;  %s479_s10 = sphi %s516_s10, %s704_s10   ;;  %s475_s9 = sphi %s514_s9, %s703_s9  }
   0x7   : > { %s27_s17 = sadd.s32 1, %s491_s13  ;;  %s39_s18 = sadd.s32 1, %s483_s11 }
   0x8   : > { %p28_p0 = scmp.ge.s32.totalorder %s27_s17, 2  ;;  %p46_p1 = scmp.ne.s32.totalorder %s483_s11, %s479_s10 }
   0x9   : > { %p47_p2 = scmp.eq.s32.totalorder %s495_s14, 0  ;;  %p52_p3 = scmp.ne.s32.totalorder %s479_s10, %s475_s9 }
   0xa   : > { %s709_s17 = smov (%p28_p0, %s27_s17), 0  ;;  %p53_p5 = scmp.eq.s32.totalorder %s307_s15, 0 }
   0xb   : > { %p555_p4 = por %p47_p2, %p46_p1  ;;  %s34_s20 = ssub.s32 %s491_s13, %s709_s17 }
   0xc   : > { %p104_p6 = scmp.eq.s32.totalorder %s307_s15, 1  ;;  %p37_p7 = scmp.eq.s32.totalorder %s34_s20, 0 }
   0xd   : > { %p561_p8 = por %p53_p5, %p52_p3  ;;  %p110_p10 = scmp.eq.s32.totalorder %s308_s16, 1 }
   0xe   : > { %p565_p9 = por %p104_p6, %p46_p1  ;;  %p333_p13 = scmp.lt.s32.totalorder %s495_s14, 2 }
   0xf   : > { %s570_s23 = scalar_select %p37_p7, %s483_s11, %s39_s18  }
  0x10   : > { %s695_s22 = scalar_select %p565_p9, 1, 0 }
  0x11   : > { %p572_p11 = por %p110_p10, %p52_p3  ;;  %s137_s25 = sand.u32 1, %s483_s11  }
  0x12   : > { %s312_s26 = sshll.u32 %s137_s25, 1  ;;  %s313_s27 = sshll.u32 %s491_s13, 5 }
  0x13   : > { %s696_s24 = scalar_select %p572_p11, 1, 0 }
  0x14   : > { %s583_s30 = scalar_lea.hbm %s689_s0, %s313_s27  ;;  %s141_s3 = scalar_lea.vmem [#allocation2], %s312_s26 }
  0x15   : > { %s149_s4 = sshll.u32 %s141_s3, 4  ;;  %p589_p0 = pnand %p333_p13, %p555_p4  ;;  %s585_s4 = int_to_ptr.vmem [resolvable:$true] %s149_s4 }
  0x16   : > { %s138_s6 = scalar_lea.sflag [#allocation3], %s137_s25  ;;  %s383_s7 = scalar_lea.hbm %s583_s30, 32 }
  0x17   : > { %p384_p3 = scmp.ne.s32.totalorder %s583_s30, %s383_s7  ;;  %p385_p5 = pneg %p589_p0 }
  0x18   : > { %s388_s16 = scalar_lea.hbm %s689_s0, 64  ;;  %p389_p4 = scmp.lt.u32.totalorder %s583_s30, %s689_s0 }
  0x19   : > { %p386_p6 = pnand %p385_p5, %p384_p3  ;;  %p390_p10 = scmp.lt.u32.totalorder %s388_s16, %s383_s7 }
  0x1a   : > { %p392_p12 = scmp.lt.u32.totalorder %s383_s7, %s583_s30 }
  0x1b   : > { %p387_p7 = pneg %p386_p6  ;;  %p391_p13 = por %p390_p10, %p389_p4 }
  0x1d   : > { %p393_p1 = por %p392_p12, %p391_p13 }
  0x1f   : > { %p394_p2 = pnand %p393_p1, %p387_p7 }
  0x21   : > { %397 = shalt.err (!%p394_p2)
}
  0x22   : > { %s398_s20 = scalar_lea.vmem %s585_s4, 32  ;;  %s497_s25 = smov [#allocation2]  }
  0x23   : > { %p399_p3 = scmp.ne.s32.totalorder %s585_s4, %s398_s20  ;;  %s403_s26 = sshll.u32 %s497_s25, 4  ;;  %s404_s26 = int_to_ptr.vmem [resolvable:$false] %s403_s26 }
  0x24   : > { %s405_s27 = scalar_lea.vmem %s404_s26, 64  ;;  %p406_p9 = scmp.lt.s32.totalorder %s585_s4, %s404_s26 }
  0x25   : > { %p401_p6 = pnand %p399_p3, %p385_p5  ;;  %p407_p4 = scmp.lt.s32.totalorder %s405_s27, %s398_s20 }
  0x27   : > { %p402_p11 = pneg %p401_p6  ;;  %p408_p10 = por %p407_p4, %p406_p9 }
  0x29   : > { %p409_p12 = pnand %p408_p10, %p402_p11 }
  0x2b   : > { %412 = shalt.err (!%p409_p12)
}
  0x2c   : > { %328 = dma.hbm_to_vmem [thread:$0]  (!%p589_p0), %s583_s30, 32, %s585_s4, %s138_s6  }
  0x2d   : > { %p698_p1 = scmp.lt.s32.totalorder %s495_s14, 3  ;;  %p699_p2 = scmp.ge.s32.totalorder %s495_s14, 1 }
  0x2f   : > { %p155_p5 = pnand %p699_p2, %p698_p1 }
  0x30   : > { %s625_s28 = sand.u32 (!%p155_p5), 1, %s479_s10  }
  0x31   : > { %158 = sbr.rel (%p155_p5) target bundleno = 83 (0x53), region = 28  ;;  %s315_s29 = sshll.u32 (!%p155_p5), %s625_s28, 1 }
  0x32   : > { %s161_s3 = scalar_lea.sflag (!%p155_p5), [#allocation3], %s625_s28  ;;  %s164_s7 = scalar_lea.vmem (!%p155_p5), [#allocation2], %s315_s29 }
  0x38   : > { %466 = dma.done.wait (%p561_p8), %s161_s3, 32  }
  0x39   : > { %468 = vsyncadd (%p561_p8), %s161_s3, 4294967264  ;;  %s188_s30 = scalar_lea.vmem [#allocation5], %s315_s29  ;;  %s318_s5 = sshll.u32 %s487_s12, 5  ;;  %v193_v0 = vld [vmem:[%s164_s7] sm:$0x3] }
  0x3a   : > { %s212_s4 = sshll.u32 %s188_s30, 4  ;;  %v194_v1 = vld [vmem:[%s690_s1] sm:$0x3]  ;;  %s642_s21 = scalar_lea.hbm %s691_s2, %s318_s5  ;;  %s637_s4 = int_to_ptr.vmem [resolvable:$true] %s212_s4 }
  0x3b   : > { %v195_v2 = vadd.f32 %v194_v1, %v193_v0  ;;  %s198_s18 = scalar_lea.sflag [#allocation4], %s625_s28  ;;  %s413_s19 = scalar_lea.vmem %s637_s4, 32 }
  0x3c   : > { %p414_p8 = scmp.ne.s32.totalorder %s637_s4, %s413_s19  ;;  %p700_p9 = scmp.ne.s32.totalorder %s695_s22, 0 }
  0x3d   : > { %196 = vst [vmem:[%s188_s30] sm:$0x3] %v195_v2  ;;  %s498_s12 = smov [#allocation5]  }
  0x3e   : > { %p415_p11 = pnand %p414_p8, %p700_p9  ;;  %s417_s20 = sshll.u32 %s498_s12, 4  ;;  %s418_s20 = int_to_ptr.vmem [resolvable:$false] %s417_s20 }
  0x3f   : > { %s419_s25 = scalar_lea.vmem %s418_s20, 64  ;;  %p420_p7 = scmp.lt.s32.totalorder %s637_s4, %s418_s20 }
  0x40   : > { %p416_p0 = pneg %p415_p11  ;;  %p421_p13 = scmp.lt.s32.totalorder %s419_s25, %s413_s19 }
  0x42   : > { %p422_p3 = por %p421_p13, %p420_p7 }
  0x44   : > { %p423_p6 = pnand %p422_p3, %p416_p0 }
  0x46   : > { %426 = shalt.err (!%p423_p6)
}
  0x47   : > { %s427_s26 = scalar_lea.hbm %s642_s21, 32  ;;  %s431_s29 = scalar_lea.hbm %s691_s2, 64 }
  0x48   : > { %p428_p4 = scmp.ne.s32.totalorder %s642_s21, %s427_s26  ;;  %p432_p1 = scmp.lt.u32.totalorder %s642_s21, %s691_s2 }
  0x49   : > { %p433_p2 = scmp.lt.u32.totalorder %s431_s29, %s427_s26  ;;  %p435_p8 = scmp.lt.u32.totalorder %s427_s26, %s642_s21 }
  0x4a   : > { %p429_p10 = pnand %p428_p4, %p700_p9 }
  0x4b   : > { %p434_p5 = por %p433_p2, %p432_p1 }
  0x4c   : > { %p430_p12 = pneg %p429_p10 }
  0x4d   : > { %p436_p11 = por %p435_p8, %p434_p5 }
  0x4f   : > { %p437_p0 = pnand %p436_p11, %p430_p12 }
  0x51   : > { %440 = shalt.err (!%p437_p0)
}
  0x52   : > { %323 = dma.vmem_to_hbm [thread:$0]  (%p700_p9), %s637_s4, 32, %s642_s21, %s198_s18  }
  0x53 PF: > { %s224_s30 = sand.u32 1, %s475_s9   ;;  %p701_p7 = scmp.ne.s32.totalorder %s696_s24, 0 }
  0x54   : > { %p702_p13 = scmp.ge.s32.totalorder %s495_s14, 2  ;;  %s225_s5 = scalar_lea.sflag [#allocation4], %s224_s30 }
  0x56   : > { %p330_p3 = pnand %p702_p13, %p701_p7 }
  0x58   : > { %470 = dma.done.wait (!%p330_p3), %s225_s5, 32  }
  0x59   : > { %472 = vsyncadd (!%p330_p3), %s225_s5, 4294967264  ;;  %s18_s14 = sadd.s32 1, %s495_s14   ;;  %s703_s9 = smov %s479_s10 }
  0x5a   : > { %p15_p6 = scmp.ge.s32.totalorder %s18_s14, 4   ;;  %s704_s10 = smov %s483_s11 }
  0x5b   : > { %s705_s11 = smov %s570_s23  ;;  %s706_s12 = smov %s491_s13 }
  0x5c   : > { %s707_s13 = smov %s709_s17  ;;  %17 = sbr.rel (!%p15_p6) target bundleno = 6 (0x6), region = 76 }
  0x63   :  { %230 = vsyncpa [#allocation3], 1 }
  0x64   :  { %232 = vsyncpa [#allocation3 + $0x1], 1 }
  0x65   :  { %233 = vsyncpa [#allocation4], 1 }
  0x66   :  { %235 = vsyncpa [#allocation4 + $0x1], 1 }

</bundles_post_ra>
